<compile_context>
chip_gen: v6e
topology: v6e:2x2x1
jax: 0.10.0
libtpu: 0.0.40
codegen_flags: <defaults>
</compile_context>

<pallas_src>
import jax
import jax.numpy as jnp
from jax.experimental import pallas as pl
from jax.experimental.pallas import tpu as pltpu


def fc_kernel(x_ref, w_ref, b_ref, o_ref):
    """y = relu(x @ W + b) for one (tm, tn) output slab."""
    y = jnp.dot(x_ref[...], w_ref[...], preferred_element_type=jnp.float32)
    y = y + b_ref[...]                       # (1, tn) bias broadcast, f32
    o_ref[...] = jnp.maximum(y, 0.0).astype(o_ref.dtype)


def _round_up(x, m):
    return (x + m - 1) // m * m


def _is_v7x():
    try:
        return "v7" in jax.devices()[0].device_kind.lower()
    except Exception:
        return False


def prepare_fc_params(w, b):
    """One-time parameter prep (do this ONCE, outside the per-call hot path).

    w: (in_features, out_features) f32  -- transpose of nn.Linear.weight
    b: (out_features,) f32
    Returns (w_bf16, b_row_f32) ready for fc_layer_forward.
    """
    return w.astype(jnp.bfloat16), b.reshape(1, -1).astype(jnp.float32)


def fc_layer_forward(x, w, b_row, *, out_dtype=jnp.float32):
    """x: (M, K), w: (K, N) [bf16 preferred], b_row: (1, N) f32 -> (M, N)."""
    M, K = x.shape
    K2, N = w.shape
    assert K == K2 and b_row.shape == (1, N)
    assert K % 128 == 0 and N % 128 == 0, "feature dims must be lane-aligned"

    # Only cast if the caller did not already hand us bf16 (prefer bf16
    # activations upstream; the weight should come pre-cast from
    # prepare_fc_params so no per-call weight convert happens here).
    if x.dtype != jnp.bfloat16:
        x = x.astype(jnp.bfloat16)
    if w.dtype != jnp.bfloat16:
        w = w.astype(jnp.bfloat16)
    if b_row.dtype != jnp.float32:
        b_row = b_row.astype(jnp.float32)

    # --- Row tiling ---------------------------------------------------------
    # Small batch: one resident row block, rounded to 16 (bf16 sublane packing).
    # Large batch: 512-row tiles (near HBM roofline), partial trailing block OK.
    tm = _round_up(M, 16) if M <= 512 else 512
    grid_m = pl.cdiv(M, tm)

    # --- Column tiling ------------------------------------------------------
    # v7x has 2 TensorCores: on the weight-DMA-bound small-batch path, split N
    # so each TC fetches/computes half of W.  Single lane-dense block elsewhere.
    if _is_v7x() and grid_m == 1 and N >= 512 and (N // 2) % 128 == 0:
        tn = N // 2
    else:
        tn = N

    # VMEM guard for the resident-weight strategy (conservative 16 MiB budget,
    # safe on v7x's smaller VMEM): shrink tn until the working set fits.
    out_bytes = jnp.dtype(out_dtype).itemsize
    def _working_set(tn_):
        return (2 * tm * K * 2        # x tile (bf16, double buffered)
                + 2 * K * tn_ * 2     # W tile (bf16)
                + 2 * tm * tn_ * out_bytes
                + 2 * tn_ * 4)        # bias
    while (_working_set(tn) > 16 * 1024 * 1024 and tn > 128
           and tn % 2 == 0 and (tn // 2) % 128 == 0 and N % (tn // 2) == 0):
        tn //= 2
    grid_n = N // tn

    cost = pl.CostEstimate(
        flops=2 * M * K * N,
        transcendentals=0,
        bytes_accessed=(M * K * 2          # x (bf16)
                        + K * N * 2        # W (bf16)
                        + N * 4            # bias (f32)
                        + M * N * out_bytes),
    )

    return pl.pallas_call(
        fc_kernel,
        out_shape=jax.ShapeDtypeStruct((M, N), out_dtype),
        grid_spec=pltpu.PrefetchScalarGridSpec(
            num_scalar_prefetch=0,
            grid=(grid_m, grid_n),
            in_specs=[
                pl.BlockSpec((tm, K), lambda i, j: (i, 0)),   # x row slab
                pl.BlockSpec((K, tn), lambda i, j: (0, j)),   # weight columns
                pl.BlockSpec((1, tn), lambda i, j: (0, j)),   # bias columns
            ],
            out_specs=pl.BlockSpec((tm, tn), lambda i, j: (i, j)),
        ),
        compiler_params=pltpu.CompilerParams(
            dimension_semantics=("parallel", "parallel"),
        ),
        cost_estimate=cost,
    )(x, w, b_row)


if __name__ == "__main__":
    key = jax.random.PRNGKey(0)
    k_x, k_w, k_b, k_x2 = jax.random.split(key, 4)

    in_size, out_size = 1024, 512            # FCLayer(in_size=1024) -> 512

    # Deterministic synthetic parameters (nn.Linear(in_size, 512) shapes;
    # weight stored as (in, out) = transpose of PyTorch's .weight).
    w = jax.random.normal(k_w, (in_size, out_size), dtype=jnp.float32) * (
        1.0 / jnp.sqrt(in_size))
    b = jax.random.normal(k_b, (out_size,), dtype=jnp.float32) * 0.01

    # One-time parameter prep (weight bf16 cast hoisted out of the hot path).
    w_bf, b_row = prepare_fc_params(w, b)
    w_bf = jax.block_until_ready(w_bf)
    b_row = jax.block_until_ready(b_row)

    def run_and_check(x):
        out = jax.block_until_ready(fc_layer_forward(x, w_bf, b_row))
        assert out.shape == (x.shape[0], out_size)
        # Reference 1: same bf16-rounded operands, f32 accumulate (tight).
        x_r = x.astype(jnp.bfloat16).astype(jnp.float32)
        w_r = w.astype(jnp.bfloat16).astype(jnp.float32)
        ref_bf = jnp.maximum(x_r @ w_r + b, 0.0)
        assert jnp.allclose(out, ref_bf, atol=2e-3, rtol=2e-3), "bf16-ref mismatch"
        # Reference 2: full f32 Linear + ReLU (loose; bf16 weight rounding).
        ref_f32 = jnp.maximum(x @ w + b, 0.0)
        assert jnp.allclose(out, ref_f32, atol=1e-1, rtol=5e-2), "f32-ref mismatch"
        return out

    # Small-batch path (single row block; N split across TCs only on v7x).
    run_and_check(jax.random.normal(k_x, (8, in_size), dtype=jnp.float32))

    # Large-batch path: tm=512 with a partial trailing row block (no jnp.pad).
    run_and_check(jax.random.normal(k_x2, (520, in_size), dtype=jnp.float32))

    print("KERNEL_OK")
</pallas_src>

<mosaic_0001>
module attributes {stable_mosaic.version = 11 : i64} {
  func.func @fc_kernel(%arg0: i32, %arg1: i32, %arg2: memref<16x1024xbf16, #tpu.memory_space<vmem>>, %arg3: memref<1024x512xbf16, #tpu.memory_space<vmem>>, %arg4: memref<1x512xf32, #tpu.memory_space<vmem>>, %arg5: memref<16x512xf32, #tpu.memory_space<vmem>>) attributes {dimension_semantics = [#tpu.dimension_semantics<parallel>, #tpu.dimension_semantics<parallel>], iteration_bounds = array<i64: 1, 1>, scalar_prefetch = 0 : i64, scratch_operands = 0 : i64, tpu.core_type = #tpu.core_type<tc>, window_params = [{transform_indices = @transform_0, window_bounds = array<i64: 16, 1024>}, {transform_indices = @transform_1, window_bounds = array<i64: 1024, 512>}, {transform_indices = @transform_2, window_bounds = array<i64: 1, 512>}, {transform_indices = @transform_3, window_bounds = array<i64: 16, 512>}]} {
    %c0 = arith.constant 0 : index
    %c0_0 = arith.constant 0 : index
    %0 = vector.load %arg2[%c0, %c0_0] : memref<16x1024xbf16, #tpu.memory_space<vmem>>, vector<16x1024xbf16>
    %c0_1 = arith.constant 0 : index
    %c0_2 = arith.constant 0 : index
    %1 = vector.load %arg3[%c0_1, %c0_2] : memref<1024x512xbf16, #tpu.memory_space<vmem>>, vector<1024x512xbf16>
    %cst = arith.constant dense<0.000000e+00> : vector<16x512xf32>
    %2 = tpu.matmul %0, %1, %cst {dimension_numbers = #tpu.dot_dimension_numbers<[1], [0], [0], [1], [0, 0, 1, 1], [], []>} : vector<16x1024xbf16>, vector<1024x512xbf16>, vector<16x512xf32> -> vector<16x512xf32>
    %c0_3 = arith.constant 0 : index
    %c0_4 = arith.constant 0 : index
    %3 = vector.load %arg4[%c0_3, %c0_4] : memref<1x512xf32, #tpu.memory_space<vmem>>, vector<1x512xf32>
    %4 = vector.broadcast %3 : vector<1x512xf32> to vector<16x512xf32>
    %5 = arith.addf %2, %4 : vector<16x512xf32>
    %cst_5 = arith.constant 0.000000e+00 : f32
    %6 = vector.broadcast %cst_5 : f32 to vector<16x512xf32>
    %7 = arith.maximumf %5, %6 : vector<16x512xf32>
    %c0_6 = arith.constant 0 : index
    %c0_7 = arith.constant 0 : index
    %8 = vector.load %arg5[%c0_6, %c0_7] : memref<16x512xf32, #tpu.memory_space<vmem>>, vector<16x512xf32>
    tpu.vector_store %arg5[%c0_6, %c0_7], %7 {strides = array<i32>} : memref<16x512xf32, #tpu.memory_space<vmem>>, vector<16x512xf32>,
    return
  }
  func.func @transform_0(%arg0: i32, %arg1: i32) -> (i32, i32) {
    %c0_i32 = arith.constant 0 : i32
    %c0_i32_0 = arith.constant 0 : i32
    return %arg0, %c0_i32 : i32, i32
  }
  func.func @transform_1(%arg0: i32, %arg1: i32) -> (i32, i32) {
    %c0_i32 = arith.constant 0 : i32
    %c0_i32_0 = arith.constant 0 : i32
    return %c0_i32, %arg1 : i32, i32
  }
  func.func @transform_2(%arg0: i32, %arg1: i32) -> (i32, i32) {
    %c0_i32 = arith.constant 0 : i32
    %c0_i32_0 = arith.constant 0 : i32
    return %c0_i32, %arg1 : i32, i32
  }
  func.func @transform_3(%arg0: i32, %arg1: i32) -> (i32, i32) {
    %c0_i32 = arith.constant 0 : i32
    return %arg0, %arg1 : i32, i32
  }
}

</mosaic_0001>

<bundles_post_ra>
// kernel: tpu_custom_call.1
= control target key start
LH: loop header
LB: loop body
LE: loop exit
PB: predicated region body
PF: predicated region fallthrough
CT: control target
= control target key end

     0   :  { %8 = vsyncpa [#allocation3], 0  ;;  %s2874_s0 = inlined_call_operand.hbm [shape: bf16[8,1024], index: 0, kind: input, shape index: {}]   ;;  %s2875_s1 = inlined_call_operand.hbm [shape: bf16[1024,512], index: 1, kind: input, shape index: {}]   ;;  %s2876_s2 = inlined_call_operand.hbm [shape: f32[1,512], index: 2, kind: input, shape index: {}]   ;;  %s2877_s3 = inlined_call_operand.hbm [shape: f32[8,512], index: 3, kind: output, shape index: {}]  }
   0x1   :  { %9 = vsyncpa [#allocation6], 0 }
   0x2   :  { %10 = vsyncpa [#allocation4], 0 }
   0x3   :  { %15 = vsyncadd [#allocation3], 512  ;;  %s2780_s12 = smov [#allocation5]  }
   0x4   :  { %s28_s13 = sshll.u32 %s2780_s12, 4  ;;  %s29_s13 = int_to_ptr.vmem [resolvable:$true] %s28_s13 }
   0x5   :  { %s2702_s14 = scalar_lea.vmem %s29_s13, 32768  ;;  %p2707_p1 = scmp.lt.s32.totalorder %s29_s13, %s29_s13 }
   0x6   :  { %p2703_p0 = scmp.ne.s32.totalorder %s29_s13, %s2702_s14  ;;  %p2708_p2 = scmp.lt.s32.totalorder %s2702_s14, %s2702_s14 }
   0x8   :  { %p2709_p3 = por %p2708_p2, %p2707_p1 }
   0xa   :  { %p2710_p4 = pnand %p2709_p3, %p2703_p0 }
   0xc   :  { %2713 = shalt.err (!%p2710_p4)
}
   0xd   :  { %s2781_s15 = smov 256   ;;  %s2782_s16 = smov 16  }
   0xe   :  { %34 = dma.hbm_to_vmem [thread:$0]  %s2875_s1, 32768, %s29_s13, [#allocation6], %s2781_s15, %s2781_s15, %s2782_s16  }
   0xf   :  { %s2783_s19 = smov [#allocation2]  }
  0x10   :  { %s16_s20 = sshll.u32 %s2783_s19, 4  ;;  %s17_s20 = int_to_ptr.vmem [resolvable:$true] %s16_s20 }
  0x11   :  { %s2722_s21 = scalar_lea.vmem %s17_s20, 512  ;;  %s2726_s22 = scalar_lea.vmem %s17_s20, 1024 }
  0x12   :  { %p2723_p5 = scmp.ne.s32.totalorder %s17_s20, %s2722_s21  ;;  %p2727_p6 = scmp.lt.s32.totalorder %s17_s20, %s17_s20 }
  0x13   :  { %p2728_p7 = scmp.lt.s32.totalorder %s2726_s22, %s2722_s21 }
  0x15   :  { %p2729_p8 = por %p2728_p7, %p2727_p6 }
  0x17   :  { %p2730_p9 = pnand %p2729_p8, %p2723_p5 }
  0x19   :  { %2733 = shalt.err (!%p2730_p9)
}
  0x1a   :  { %s2784_s23 = smov 512   ;;  %s2785_s24 = smov 32  }
  0x1b   :  { %22 = dma.hbm_to_vmem [thread:$0]  %s2874_s0, 512, %s17_s20, [#allocation3], %s2784_s23, %s2784_s23, %s2785_s24  }
  0x1c   :  { %s2786_s1 = smov [#allocation7]  }
  0x1d   :  { %s41_s27 = sshll.u32 %s2786_s1, 4  ;;  %s42_s27 = int_to_ptr.vmem [resolvable:$true] %s41_s27 }
  0x1e   :  { %s2742_s28 = scalar_lea.vmem %s42_s27, 64  ;;  %p2747_p11 = scmp.lt.s32.totalorder %s42_s27, %s42_s27 }
  0x1f   :  { %p2743_p10 = scmp.ne.s32.totalorder %s42_s27, %s2742_s28  ;;  %p2748_p12 = scmp.lt.s32.totalorder %s2742_s28, %s2742_s28 }
  0x21   :  { %p2749_p13 = por %p2748_p12, %p2747_p11 }
  0x23   :  { %p2750_p0 = pnand %p2749_p13, %p2743_p10 }
  0x25   :  { %2753 = shalt.err (!%p2750_p0)
}
  0x26   :  { %44 = dma.hbm_to_vmem [thread:$0]  %s2876_s2, 64, %s42_s27, [#allocation6]  }
  0x27   :  { %2774 = dma.done.wait [#allocation3], 1024  }
  0x28   :  { %2775 = vsyncadd [#allocation3], 4294966272 }
  0x29   :  { %2776 = dma.done.wait [#allocation6], 32832  }
  0x2a   :  { %2777 = vsyncadd [#allocation6], 4294934464  ;;  %v2310_v0 = vld [vmem:[#allocation5 + $0xe4] ss:$16 sps:$4 sm:$0xff]   ;;  %v2314_v2 = vld [vmem:[#allocation5 + $0xe0] ss:$16 sps:$4 sm:$0xff]  }
  0x2b   :  { %v2312_v1 = vld [vmem:[#allocation5 + $0x2e4] ss:$16 sps:$4 sm:$0xff]   ;;  %1660 = vmatprep.subr.bf16.mxu0 %v2310_v0  ;;  %v2315_v3 = vld [vmem:[#allocation5 + $0x2e0] ss:$16 sps:$4 sm:$0xff]   ;;  %v55_v50 = vld [vmem:[#allocation2 + $0x8] sm:$0xff] }
  0x2c   :  { %1703 = vmatprep.subr.bf16.mxu1 %v2312_v1  ;;  %v2316_v4 = vld [vmem:[#allocation5 + $0xc4] ss:$16 sps:$4 sm:$0xff]   ;;  %1661 = vmatpush1.bf16.msra.mxu0 %v2314_v2  ;;  %v2320_v6 = vld [vmem:[#allocation5 + $0xc0] ss:$16 sps:$4 sm:$0xff]   ;;  %v59_v51 = vld [vmem:[#allocation2 + $0x28] sm:$0xff] }
  0x2d   :  { %1704 = vmatpush1.bf16.msra.mxu1 %v2315_v3  ;;  %v2318_v5 = vld [vmem:[#allocation5 + $0x2c4] ss:$16 sps:$4 sm:$0xff]   ;;  %1662 = vmatprep.subr.bf16.mxu0 %v2316_v4  ;;  %v2321_v7 = vld [vmem:[#allocation5 + $0x2c0] ss:$16 sps:$4 sm:$0xff]   ;;  %v2822_v55 = vcombine.high %v55_v50, %v59_v51 }
  0x2e   :  { %1705 = vmatprep.subr.bf16.mxu1 %v2318_v5  ;;  %v2322_v8 = vld [vmem:[#allocation5 + $0xa4] ss:$16 sps:$4 sm:$0xff]   ;;  %v2326_v10 = vld [vmem:[#allocation5 + $0xa0] ss:$16 sps:$4 sm:$0xff]  }
  0x2f   :  { %v2324_v9 = vld [vmem:[#allocation5 + $0x2a4] ss:$16 sps:$4 sm:$0xff]   ;;  %v2327_v11 = vld [vmem:[#allocation5 + $0x2a0] ss:$16 sps:$4 sm:$0xff]   ;;  %1735 = vmatprep.mubr.bf16.mxu1 %v2822_v55 }
  0x30   :  { %1663 = vmatpush1.bf16.msra.mxu0 %v2320_v6  ;;  %v2328_v12 = vld [vmem:[#allocation5 + $0x84] ss:$16 sps:$4 sm:$0xff]   ;;  %v2332_v14 = vld [vmem:[#allocation5 + $0x80] ss:$16 sps:$4 sm:$0xff]  }
  0x31   :  { %1706 = vmatpush1.bf16.msra.mxu1 %v2321_v7  ;;  %1664 = vmatprep.subr.bf16.mxu0 %v2322_v8  ;;  %v2330_v13 = vld [vmem:[#allocation5 + $0x284] ss:$16 sps:$4 sm:$0xff]   ;;  %v2333_v15 = vld [vmem:[#allocation5 + $0x280] ss:$16 sps:$4 sm:$0xff]  }
  0x32   :  { %1707 = vmatprep.subr.bf16.mxu1 %v2324_v9  ;;  %v2334_v16 = vld [vmem:[#allocation5 + $0x64] ss:$16 sps:$4 sm:$0xff]   ;;  %v2338_v18 = vld [vmem:[#allocation5 + $0x60] ss:$16 sps:$4 sm:$0xff]   ;;  %v2828_v9 = vcombine.low %v55_v50, %v59_v51 }
  0x33   :  { %v2336_v17 = vld [vmem:[#allocation5 + $0x264] ss:$16 sps:$4 sm:$0xff]   ;;  %v2339_v19 = vld [vmem:[#allocation5 + $0x260] ss:$16 sps:$4 sm:$0xff]  }
  0x34   :  { %1665 = vmatpush1.bf16.msra.mxu0 %v2326_v10  ;;  %v2340_v20 = vld [vmem:[#allocation5 + $0x44] ss:$16 sps:$4 sm:$0xff]   ;;  %v2344_v22 = vld [vmem:[#allocation5 + $0x40] ss:$16 sps:$4 sm:$0xff]  }
  0x35   :  { %1708 = vmatpush1.bf16.msra.mxu1 %v2327_v11  ;;  %1666 = vmatprep.subr.bf16.mxu0 %v2328_v12  ;;  %v2342_v21 = vld [vmem:[#allocation5 + $0x244] ss:$16 sps:$4 sm:$0xff]   ;;  %v2345_v23 = vld [vmem:[#allocation5 + $0x240] ss:$16 sps:$4 sm:$0xff]  }
  0x36   :  { %1709 = vmatprep.subr.bf16.mxu1 %v2330_v13  ;;  %v2346_v24 = vld [vmem:[#allocation5 + $0x24] ss:$16 sps:$4 sm:$0xff]   ;;  %v2350_v26 = vld [vmem:[#allocation5 + $0x20] ss:$16 sps:$4 sm:$0xff]  }
  0x37   :  { %v2348_v25 = vld [vmem:[#allocation5 + $0x224] ss:$16 sps:$4 sm:$0xff]   ;;  %v2351_v27 = vld [vmem:[#allocation5 + $0x220] ss:$16 sps:$4 sm:$0xff]  }
  0x38   :  { %1667 = vmatpush1.bf16.msra.mxu0 %v2332_v14  ;;  %v2352_v28 = vld [vmem:[#allocation5 + $0x4] ss:$16 sps:$4 sm:$0xff]   ;;  %v2356_v30 = vld [vmem:[#allocation5] ss:$16 sps:$4 sm:$0xff]  }
  0x39   :  { %1710 = vmatpush1.bf16.msra.mxu1 %v2333_v15  ;;  %1668 = vmatprep.subr.bf16.mxu0 %v2334_v16  ;;  %v2354_v29 = vld [vmem:[#allocation5 + $0x204] ss:$16 sps:$4 sm:$0xff]   ;;  %v2357_v31 = vld [vmem:[#allocation5 + $0x200] ss:$16 sps:$4 sm:$0xff]  }
  0x3a   :  { %1711 = vmatprep.subr.bf16.mxu1 %v2336_v17  ;;  %v2358_v32 = vld [vmem:[#allocation5 + $0x1e4] ss:$16 sps:$4 sm:$0xff]   ;;  %v2362_v34 = vld [vmem:[#allocation5 + $0x1e0] ss:$16 sps:$4 sm:$0xff]  }
  0x3b   :  { %v2360_v33 = vld [vmem:[#allocation5 + $0x3e4] ss:$16 sps:$4 sm:$0xff]   ;;  %v2363_v35 = vld [vmem:[#allocation5 + $0x3e0] ss:$16 sps:$4 sm:$0xff]  }
  0x3c   :  { %1669 = vmatpush1.bf16.msra.mxu0 %v2338_v18  ;;  %v2364_v36 = vld [vmem:[#allocation5 + $0x1c4] ss:$16 sps:$4 sm:$0xff]   ;;  %v2368_v38 = vld [vmem:[#allocation5 + $0x1c0] ss:$16 sps:$4 sm:$0xff]  }
  0x3d   :  { %1712 = vmatpush1.bf16.msra.mxu1 %v2339_v19  ;;  %1670 = vmatprep.subr.bf16.mxu0 %v2340_v20  ;;  %v2366_v37 = vld [vmem:[#allocation5 + $0x3c4] ss:$16 sps:$4 sm:$0xff]   ;;  %v2369_v39 = vld [vmem:[#allocation5 + $0x3c0] ss:$16 sps:$4 sm:$0xff]  }
  0x3e   :  { %1713 = vmatprep.subr.bf16.mxu1 %v2342_v21  ;;  %v2370_v40 = vld [vmem:[#allocation5 + $0x1a4] ss:$16 sps:$4 sm:$0xff]   ;;  %v2374_v42 = vld [vmem:[#allocation5 + $0x1a0] ss:$16 sps:$4 sm:$0xff]  }
  0x3f   :  { %v2372_v41 = vld [vmem:[#allocation5 + $0x3a4] ss:$16 sps:$4 sm:$0xff]   ;;  %v2375_v43 = vld [vmem:[#allocation5 + $0x3a0] ss:$16 sps:$4 sm:$0xff]  }
  0x40   :  { %1671 = vmatpush1.bf16.msra.mxu0 %v2344_v22  ;;  %v2376_v44 = vld [vmem:[#allocation5 + $0x184] ss:$16 sps:$4 sm:$0xff]   ;;  %v2380_v46 = vld [vmem:[#allocation5 + $0x180] ss:$16 sps:$4 sm:$0xff]  }
  0x41   :  { %1714 = vmatpush1.bf16.msra.mxu1 %v2345_v23  ;;  %1672 = vmatprep.subr.bf16.mxu0 %v2346_v24  ;;  %v2378_v45 = vld [vmem:[#allocation5 + $0x384] ss:$16 sps:$4 sm:$0xff]   ;;  %v2381_v47 = vld [vmem:[#allocation5 + $0x380] ss:$16 sps:$4 sm:$0xff]  }
  0x42   :  { %1715 = vmatprep.subr.bf16.mxu1 %v2348_v25  ;;  %v54_v48 = vld [vmem:[#allocation2] sm:$0xff] }
  0x43   :  { %v58_v49 = vld [vmem:[#allocation2 + $0x20] sm:$0xff] }
  0x44   :  { %1673 = vmatpush1.bf16.msra.mxu0 %v2350_v26  ;;  %v2382_v52 = vld [vmem:[#allocation5 + $0x164] ss:$16 sps:$4 sm:$0xff]   ;;  %v2820_v53 = vcombine.high %v54_v48, %v58_v49  ;;  %v2386_v56 = vld [vmem:[#allocation5 + $0x160] ss:$16 sps:$4 sm:$0xff]   ;;  %v2826_v8 = vcombine.low %v54_v48, %v58_v49 }
  0x45   :  { %1716 = vmatpush1.bf16.msra.mxu1 %v2351_v27  ;;  %1674 = vmatprep.subr.bf16.mxu0 %v2352_v28  ;;  %v2384_v54 = vld [vmem:[#allocation5 + $0x364] ss:$16 sps:$4 sm:$0xff]   ;;  %v2387_v57 = vld [vmem:[#allocation5 + $0x360] ss:$16 sps:$4 sm:$0xff]  }
  0x46   :  { %1717 = vmatprep.subr.bf16.mxu1 %v2354_v29  ;;  %1692 = vmatprep.mubr.bf16.mxu0 %v2820_v53  ;;  %v2388_v58 = vld [vmem:[#allocation5 + $0x144] ss:$16 sps:$4 sm:$0xff]   ;;  %v2392_v60 = vld [vmem:[#allocation5 + $0x140] ss:$16 sps:$4 sm:$0xff]  }
  0x47   :  { %v2390_v59 = vld [vmem:[#allocation5 + $0x344] ss:$16 sps:$4 sm:$0xff]   ;;  %v2393_v61 = vld [vmem:[#allocation5 + $0x340] ss:$16 sps:$4 sm:$0xff]  }
  0x48   :  { %1675 = vmatpush1.bf16.msra.mxu0 %v2356_v30  ;;  %v2394_v62 = vld [vmem:[#allocation5 + $0x124] ss:$16 sps:$4 sm:$0xff]   ;;  %v2398_v0 = vld [vmem:[#allocation5 + $0x120] ss:$16 sps:$4 sm:$0xff]  }
  0x49   :  { %1718 = vmatpush1.bf16.msra.mxu1 %v2357_v31  ;;  %1676 = vmatprep.subr.bf16.mxu0 %v2358_v32  ;;  %v2396_v63 = vld [vmem:[#allocation5 + $0x324] ss:$16 sps:$4 sm:$0xff]   ;;  %v2399_v1 = vld [vmem:[#allocation5 + $0x320] ss:$16 sps:$4 sm:$0xff]  }
  0x4a   :  { %1719 = vmatprep.subr.bf16.mxu1 %v2360_v33  ;;  %v2400_v2 = vld [vmem:[#allocation5 + $0x104] ss:$16 sps:$4 sm:$0xff]   ;;  %v2404_v4 = vld [vmem:[#allocation5 + $0x100] ss:$16 sps:$4 sm:$0xff]  }
  0x4b   :  { %v2402_v3 = vld [vmem:[#allocation5 + $0x304] ss:$16 sps:$4 sm:$0xff]   ;;  %v2405_v5 = vld [vmem:[#allocation5 + $0x300] ss:$16 sps:$4 sm:$0xff]  }
  0x4c   :  { %1677 = vmatpush2.bf16.msra.mxu0 %v2362_v34  ;;  %v2408_v6 = vld [vmem:[#allocation5 + $0x4e4] ss:$16 sps:$4 sm:$0xff]   ;;  %v2406_v10 = vld [vmem:[#allocation5 + $0x4e0] ss:$16 sps:$4 sm:$0xff]  }
  0x4d   :  { %1720 = vmatpush2.bf16.msra.mxu1 %v2363_v35  ;;  %1678 = vmatprep.subr.bf16.mxu0 %v2364_v36  ;;  %v2411_v7 = vld [vmem:[#allocation5 + $0x6e4] ss:$16 sps:$4 sm:$0xff]   ;;  %v2409_v11 = vld [vmem:[#allocation5 + $0x6e0] ss:$16 sps:$4 sm:$0xff]  }
  0x4e   :  { %1721 = vmatprep.subr.bf16.mxu1 %v2366_v37  ;;  %v2414_v12 = vld [vmem:[#allocation5 + $0x4c4] ss:$16 sps:$4 sm:$0xff]   ;;  %v2412_v14 = vld [vmem:[#allocation5 + $0x4c0] ss:$16 sps:$4 sm:$0xff]  }
  0x4f   :  { %v2417_v13 = vld [vmem:[#allocation5 + $0x6c4] ss:$16 sps:$4 sm:$0xff]   ;;  %v2415_v15 = vld [vmem:[#allocation5 + $0x6c0] ss:$16 sps:$4 sm:$0xff]  }
  0x50   :  { %1679 = vmatpush2.bf16.msra.mxu0 %v2368_v38  ;;  %v2420_v16 = vld [vmem:[#allocation5 + $0x4a4] ss:$16 sps:$4 sm:$0xff]   ;;  %v2418_v18 = vld [vmem:[#allocation5 + $0x4a0] ss:$16 sps:$4 sm:$0xff]   ;;  %v2836_v38 = vld [vmem:[#allocation2 + $0x18] sm:$0xff] }
  0x51   :  { %1722 = vmatpush2.bf16.msra.mxu1 %v2369_v39  ;;  %1680 = vmatprep.subr.bf16.mxu0 %v2370_v40  ;;  %v2423_v17 = vld [vmem:[#allocation5 + $0x6a4] ss:$16 sps:$4 sm:$0xff]   ;;  %v2421_v19 = vld [vmem:[#allocation5 + $0x6a0] ss:$16 sps:$4 sm:$0xff]   ;;  %v2838_v39 = vld [vmem:[#allocation2 + $0x38] sm:$0xff] }
  0x52   :  { %1723 = vmatprep.subr.bf16.mxu1 %v2372_v41  ;;  %v2426_v20 = vld [vmem:[#allocation5 + $0x484] ss:$16 sps:$4 sm:$0xff]   ;;  %v2424_v22 = vld [vmem:[#allocation5 + $0x480] ss:$16 sps:$4 sm:$0xff]  }
  0x53   :  { %v2429_v21 = vld [vmem:[#allocation5 + $0x684] ss:$16 sps:$4 sm:$0xff]   ;;  %v2427_v23 = vld [vmem:[#allocation5 + $0x680] ss:$16 sps:$4 sm:$0xff]  }
  0x54   :  { %1681 = vmatpush2.bf16.msra.mxu0 %v2374_v42  ;;  %v2432_v24 = vld [vmem:[#allocation5 + $0x464] ss:$16 sps:$4 sm:$0xff]   ;;  %v2430_v26 = vld [vmem:[#allocation5 + $0x460] ss:$16 sps:$4 sm:$0xff]  }
  0x55   :  { %1724 = vmatpush2.bf16.msra.mxu1 %v2375_v43  ;;  %1682 = vmatprep.subr.bf16.mxu0 %v2376_v44  ;;  %v2435_v25 = vld [vmem:[#allocation5 + $0x664] ss:$16 sps:$4 sm:$0xff]   ;;  %v2433_v27 = vld [vmem:[#allocation5 + $0x660] ss:$16 sps:$4 sm:$0xff]   ;;  %v2846_v43 = vcombine.high %v2836_v38, %v2838_v39 }
  0x56   :  { %1725 = vmatprep.subr.bf16.mxu1 %v2378_v45  ;;  %v2438_v28 = vld [vmem:[#allocation5 + $0x444] ss:$16 sps:$4 sm:$0xff]   ;;  %v2436_v30 = vld [vmem:[#allocation5 + $0x440] ss:$16 sps:$4 sm:$0xff]  }
  0x57   :  { %v2441_v29 = vld [vmem:[#allocation5 + $0x644] ss:$16 sps:$4 sm:$0xff]   ;;  %v2439_v31 = vld [vmem:[#allocation5 + $0x640] ss:$16 sps:$4 sm:$0xff]  }
  0x58   :  { %1683 = vmatpush2.bf16.msra.mxu0 %v2380_v46  ;;  %v2444_v32 = vld [vmem:[#allocation5 + $0x424] ss:$16 sps:$4 sm:$0xff]   ;;  %v2442_v34 = vld [vmem:[#allocation5 + $0x420] ss:$16 sps:$4 sm:$0xff]  }
  0x59   :  { %1726 = vmatpush2.bf16.msra.mxu1 %v2381_v47  ;;  %1684 = vmatprep.subr.bf16.mxu0 %v2382_v52  ;;  %v2447_v33 = vld [vmem:[#allocation5 + $0x624] ss:$16 sps:$4 sm:$0xff]   ;;  %v2445_v35 = vld [vmem:[#allocation5 + $0x620] ss:$16 sps:$4 sm:$0xff]  }
  0x5a   :  { %1727 = vmatprep.subr.bf16.mxu1 %v2384_v54  ;;  %v2832_v36 = vld [vmem:[#allocation2 + $0x10] sm:$0xff] }
  0x5b   :  { %v2834_v37 = vld [vmem:[#allocation2 + $0x30] sm:$0xff] }
  0x5c   :  { %1685 = vmatpush2.bf16.msra.mxu0 %v2386_v56  ;;  %v2450_v40 = vld [vmem:[#allocation5 + $0x404] ss:$16 sps:$4 sm:$0xff]   ;;  %v2842_v41 = vcombine.high %v2832_v36, %v2834_v37  ;;  %v2448_v44 = vld [vmem:[#allocation5 + $0x400] ss:$16 sps:$4 sm:$0xff]  }
  0x5d   :  { %1728 = vmatpush2.bf16.msra.mxu1 %v2387_v57  ;;  %1686 = vmatprep.subr.bf16.mxu0 %v2388_v58  ;;  %v2453_v42 = vld [vmem:[#allocation5 + $0x604] ss:$16 sps:$4 sm:$0xff]   ;;  %v2451_v45 = vld [vmem:[#allocation5 + $0x600] ss:$16 sps:$4 sm:$0xff]  }
  0x5e   :  { %1729 = vmatprep.subr.bf16.mxu1 %v2390_v59  ;;  %v2456_v46 = vld [vmem:[#allocation5 + $0x5e4] ss:$16 sps:$4 sm:$0xff]   ;;  %v2454_v48 = vld [vmem:[#allocation5 + $0x5e0] ss:$16 sps:$4 sm:$0xff]  }
  0x5f   :  { %v2459_v47 = vld [vmem:[#allocation5 + $0x7e4] ss:$16 sps:$4 sm:$0xff]   ;;  %v2457_v49 = vld [vmem:[#allocation5 + $0x7e0] ss:$16 sps:$4 sm:$0xff]  }
  0x60   :  { %1687 = vmatpush2.bf16.msra.mxu0 %v2392_v60  ;;  %v2462_v50 = vld [vmem:[#allocation5 + $0x5c4] ss:$16 sps:$4 sm:$0xff]   ;;  %v2460_v52 = vld [vmem:[#allocation5 + $0x5c0] ss:$16 sps:$4 sm:$0xff]  }
  0x61   :  { %1730 = vmatpush2.bf16.msra.mxu1 %v2393_v61  ;;  %1688 = vmatprep.subr.bf16.mxu0 %v2394_v62  ;;  %v2465_v51 = vld [vmem:[#allocation5 + $0x7c4] ss:$16 sps:$4 sm:$0xff]   ;;  %v2463_v54 = vld [vmem:[#allocation5 + $0x7c0] ss:$16 sps:$4 sm:$0xff]  }
  0x62   :  { %1731 = vmatprep.subr.bf16.mxu1 %v2396_v63  ;;  %v2468_v56 = vld [vmem:[#allocation5 + $0x5a4] ss:$16 sps:$4 sm:$0xff]   ;;  %v2466_v58 = vld [vmem:[#allocation5 + $0x5a0] ss:$16 sps:$4 sm:$0xff]  }
  0x63   :  { %v2471_v57 = vld [vmem:[#allocation5 + $0x7a4] ss:$16 sps:$4 sm:$0xff]   ;;  %v2469_v59 = vld [vmem:[#allocation5 + $0x7a0] ss:$16 sps:$4 sm:$0xff]  }
  0x64   :  { %1689 = vmatpush2.bf16.msra.mxu0 %v2398_v0  ;;  %v2474_v60 = vld [vmem:[#allocation5 + $0x584] ss:$16 sps:$4 sm:$0xff]   ;;  %v2472_v62 = vld [vmem:[#allocation5 + $0x580] ss:$16 sps:$4 sm:$0xff]  }
  0x65   :  { %1732 = vmatpush2.bf16.msra.mxu1 %v2399_v1  ;;  %1690 = vmatprep.subr.bf16.mxu0 %v2400_v2  ;;  %v2477_v61 = vld [vmem:[#allocation5 + $0x784] ss:$16 sps:$4 sm:$0xff]   ;;  %v2475_v63 = vld [vmem:[#allocation5 + $0x780] ss:$16 sps:$4 sm:$0xff]  }
  0x66   :  { %1733 = vmatprep.subr.bf16.mxu1 %v2402_v3  ;;  %v2480_v0 = vld [vmem:[#allocation5 + $0x564] ss:$16 sps:$4 sm:$0xff]   ;;  %v2478_v2 = vld [vmem:[#allocation5 + $0x560] ss:$16 sps:$4 sm:$0xff]  }
  0x67   :  { %v2483_v1 = vld [vmem:[#allocation5 + $0x764] ss:$16 sps:$4 sm:$0xff]   ;;  %v2481_v3 = vld [vmem:[#allocation5 + $0x760] ss:$16 sps:$4 sm:$0xff]  }
  0x68   :  { %1691 = vmatpush2.bf16.msra.mxu0 %v2404_v4  ;;  %v2486_v4 = vld [vmem:[#allocation5 + $0x544] ss:$16 sps:$4 sm:$0xff]  }
  0x69   :  { %1734 = vmatpush2.bf16.msra.mxu1 %v2405_v5  ;;  %1746 = vmatprep.subr.bf16.mxu0 %v2408_v6  ;;  %v2489_v5 = vld [vmem:[#allocation5 + $0x744] ss:$16 sps:$4 sm:$0xff]   ;;  %v2484_v6 = vld [vmem:[#allocation5 + $0x540] ss:$16 sps:$4 sm:$0xff]  }
  0x6a   :  { %1789 = vmatprep.subr.bf16.mxu1 %v2411_v7  ;;  %v2487_v7 = vld [vmem:[#allocation5 + $0x740] ss:$16 sps:$4 sm:$0xff]  }
  0x6b   :  { %1693 = vmatmul.mubr.bf16.vlgmr.msra.gmra.mxu0 %v2826_v8 }
  0x6c   :  { %1736 = vmatmul.mubr.bf16.vlgmr.msra.gmra.mxu1 %v2828_v9  ;;  %1747 = vmatpush1.bf16.msra.mxu0 %v2406_v10  ;;  %v2492_v10 = vld [vmem:[#allocation5 + $0x524] ss:$16 sps:$4 sm:$0xff]  }
  0x6d   :  { %1790 = vmatpush1.bf16.msra.mxu1 %v2409_v11  ;;  %1748 = vmatprep.subr.bf16.mxu0 %v2414_v12  ;;  %v2495_v11 = vld [vmem:[#allocation5 + $0x724] ss:$16 sps:$4 sm:$0xff]   ;;  %v2490_v12 = vld [vmem:[#allocation5 + $0x520] ss:$16 sps:$4 sm:$0xff]  }
  0x6e   :  { %1791 = vmatprep.subr.bf16.mxu1 %v2417_v13  ;;  %1778 = vmatprep.mubr.bf16.mxu0 %v2842_v41  ;;  %v2493_v13 = vld [vmem:[#allocation5 + $0x720] ss:$16 sps:$4 sm:$0xff]  }
  0x6f   :  { %1821 = vmatprep.mubr.bf16.mxu1 %v2846_v43 }
  0x70   :  { %1749 = vmatpush1.bf16.msra.mxu0 %v2412_v14  ;;  %v2498_v14 = vld [vmem:[#allocation5 + $0x504] ss:$16 sps:$4 sm:$0xff]  }
  0x71   :  { %1792 = vmatpush1.bf16.msra.mxu1 %v2415_v15  ;;  %1750 = vmatprep.subr.bf16.mxu0 %v2420_v16  ;;  %v2501_v15 = vld [vmem:[#allocation5 + $0x704] ss:$16 sps:$4 sm:$0xff]   ;;  %v2496_v16 = vld [vmem:[#allocation5 + $0x500] ss:$16 sps:$4 sm:$0xff]  }
  0x72   :  { %1793 = vmatprep.subr.bf16.mxu1 %v2423_v17  ;;  %v2499_v17 = vld [vmem:[#allocation5 + $0x700] ss:$16 sps:$4 sm:$0xff]  }
  0x74   :  { %1751 = vmatpush1.bf16.msra.mxu0 %v2418_v18  ;;  %v2504_v18 = vld [vmem:[#allocation5 + $0xec] ss:$16 sps:$4 sm:$0xff]  }
  0x75   :  { %1794 = vmatpush1.bf16.msra.mxu1 %v2421_v19  ;;  %1752 = vmatprep.subr.bf16.mxu0 %v2426_v20  ;;  %v2507_v19 = vld [vmem:[#allocation5 + $0x2ec] ss:$16 sps:$4 sm:$0xff]   ;;  %v2852_v20 = vcombine.low %v2832_v36, %v2834_v37 }
  0x76   :  { %1795 = vmatprep.subr.bf16.mxu1 %v2429_v21  ;;  %v2856_v21 = vcombine.low %v2836_v38, %v2838_v39  ;;  %v2528_v36 = vld [vmem:[#allocation5 + $0x6c] ss:$16 sps:$4 sm:$0xff]   ;;  %v2526_v38 = vld [vmem:[#allocation5 + $0x68] ss:$16 sps:$4 sm:$0xff]  }
  0x77   :  { %v2531_v37 = vld [vmem:[#allocation5 + $0x26c] ss:$16 sps:$4 sm:$0xff]  }
  0x78   :  { %1753 = vmatpush1.bf16.msra.mxu0 %v2424_v22  ;;  %v2502_v22 = vld [vmem:[#allocation5 + $0xe8] ss:$16 sps:$4 sm:$0xff]   ;;  %v2537_v39 = vld [vmem:[#allocation5 + $0x24c] ss:$16 sps:$4 sm:$0xff]  }
  0x79   :  { %1796 = vmatpush1.bf16.msra.mxu1 %v2427_v23  ;;  %1754 = vmatprep.subr.bf16.mxu0 %v2432_v24  ;;  %v2505_v23 = vld [vmem:[#allocation5 + $0x2e8] ss:$16 sps:$4 sm:$0xff]   ;;  %v2510_v24 = vld [vmem:[#allocation5 + $0xcc] ss:$16 sps:$4 sm:$0xff]  }
  0x7a   :  { %1797 = vmatprep.subr.bf16.mxu1 %v2435_v25  ;;  %v2513_v25 = vld [vmem:[#allocation5 + $0x2cc] ss:$16 sps:$4 sm:$0xff]  }
  0x7c   :  { %1755 = vmatpush1.bf16.msra.mxu0 %v2430_v26  ;;  %v2508_v26 = vld [vmem:[#allocation5 + $0xc8] ss:$16 sps:$4 sm:$0xff]  }
  0x7d   :  { %1798 = vmatpush1.bf16.msra.mxu1 %v2433_v27  ;;  %1756 = vmatprep.subr.bf16.mxu0 %v2438_v28  ;;  %v2511_v27 = vld [vmem:[#allocation5 + $0x2c8] ss:$16 sps:$4 sm:$0xff]   ;;  %v2516_v28 = vld [vmem:[#allocation5 + $0xac] ss:$16 sps:$4 sm:$0xff]  }
  0x7e   :  { %1799 = vmatprep.subr.bf16.mxu1 %v2441_v29  ;;  %v2519_v29 = vld [vmem:[#allocation5 + $0x2ac] ss:$16 sps:$4 sm:$0xff]  }
  0x80   :  { %1757 = vmatpush1.bf16.msra.mxu0 %v2436_v30  ;;  %v2514_v30 = vld [vmem:[#allocation5 + $0xa8] ss:$16 sps:$4 sm:$0xff]  }
  0x81   :  { %1800 = vmatpush1.bf16.msra.mxu1 %v2439_v31  ;;  %1758 = vmatprep.subr.bf16.mxu0 %v2444_v32  ;;  %v2517_v31 = vld [vmem:[#allocation5 + $0x2a8] ss:$16 sps:$4 sm:$0xff]   ;;  %v2522_v32 = vld [vmem:[#allocation5 + $0x8c] ss:$16 sps:$4 sm:$0xff]  }
  0x82   :  { %1801 = vmatprep.subr.bf16.mxu1 %v2447_v33  ;;  %v2525_v33 = vld [vmem:[#allocation5 + $0x28c] ss:$16 sps:$4 sm:$0xff]  }
  0x84   :  { %1759 = vmatpush1.bf16.msra.mxu0 %v2442_v34  ;;  %v2520_v34 = vld [vmem:[#allocation5 + $0x88] ss:$16 sps:$4 sm:$0xff]  }
  0x85   :  { %1802 = vmatpush1.bf16.msra.mxu1 %v2445_v35  ;;  %1760 = vmatprep.subr.bf16.mxu0 %v2450_v40  ;;  %v2523_v35 = vld [vmem:[#allocation5 + $0x288] ss:$16 sps:$4 sm:$0xff]  }
  0x86   :  { %1803 = vmatprep.subr.bf16.mxu1 %v2453_v42  ;;  %v2532_v40 = vld [vmem:[#allocation5 + $0x48] ss:$16 sps:$4 sm:$0xff]  }
  0x87   :  { %v2535_v42 = vld [vmem:[#allocation5 + $0x248] ss:$16 sps:$4 sm:$0xff]  }
  0x88   :  { %1761 = vmatpush1.bf16.msra.mxu0 %v2448_v44  ;;  %v2540_v44 = vld [vmem:[#allocation5 + $0x2c] ss:$16 sps:$4 sm:$0xff]  }
  0x89   :  { %1804 = vmatpush1.bf16.msra.mxu1 %v2451_v45  ;;  %1762 = vmatprep.subr.bf16.mxu0 %v2456_v46  ;;  %v2543_v45 = vld [vmem:[#allocation5 + $0x22c] ss:$16 sps:$4 sm:$0xff]   ;;  %v2538_v46 = vld [vmem:[#allocation5 + $0x28] ss:$16 sps:$4 sm:$0xff]  }
  0x8a   :  { %1805 = vmatprep.subr.bf16.mxu1 %v2459_v47  ;;  %v2541_v47 = vld [vmem:[#allocation5 + $0x228] ss:$16 sps:$4 sm:$0xff]  }
  0x8c   :  { %1763 = vmatpush2.bf16.msra.mxu0 %v2454_v48  ;;  %v2546_v48 = vld [vmem:[#allocation5 + $0xc] ss:$16 sps:$4 sm:$0xff]  }
  0x8d   :  { %1806 = vmatpush2.bf16.msra.mxu1 %v2457_v49  ;;  %1764 = vmatprep.subr.bf16.mxu0 %v2462_v50  ;;  %v2549_v49 = vld [vmem:[#allocation5 + $0x20c] ss:$16 sps:$4 sm:$0xff]   ;;  %v2544_v50 = vld [vmem:[#allocation5 + $0x8] ss:$16 sps:$4 sm:$0xff]  }
  0x8e   :  { %1807 = vmatprep.subr.bf16.mxu1 %v2465_v51  ;;  %v2547_v51 = vld [vmem:[#allocation5 + $0x208] ss:$16 sps:$4 sm:$0xff]  }
  0x90   :  { %1765 = vmatpush2.bf16.msra.mxu0 %v2460_v52  ;;  %v2552_v52 = vld [vmem:[#allocation5 + $0x1ec] ss:$16 sps:$4 sm:$0xff]  }
  0x91   :  { %1808 = vmatpush2.bf16.msra.mxu1 %v2463_v54  ;;  %1766 = vmatprep.subr.bf16.mxu0 %v2468_v56  ;;  %v2555_v54 = vld [vmem:[#allocation5 + $0x3ec] ss:$16 sps:$4 sm:$0xff]   ;;  %v2550_v56 = vld [vmem:[#allocation5 + $0x1e8] ss:$16 sps:$4 sm:$0xff]  }
  0x92   :  { %1809 = vmatprep.subr.bf16.mxu1 %v2471_v57  ;;  %v2553_v57 = vld [vmem:[#allocation5 + $0x3e8] ss:$16 sps:$4 sm:$0xff]  }
  0x94   :  { %1767 = vmatpush2.bf16.msra.mxu0 %v2466_v58  ;;  %v2558_v58 = vld [vmem:[#allocation5 + $0x1cc] ss:$16 sps:$4 sm:$0xff]  }
  0x95   :  { %1810 = vmatpush2.bf16.msra.mxu1 %v2469_v59  ;;  %1768 = vmatprep.subr.bf16.mxu0 %v2474_v60  ;;  %v2561_v59 = vld [vmem:[#allocation5 + $0x3cc] ss:$16 sps:$4 sm:$0xff]   ;;  %v2556_v60 = vld [vmem:[#allocation5 + $0x1c8] ss:$16 sps:$4 sm:$0xff]  }
  0x96   :  { %1811 = vmatprep.subr.bf16.mxu1 %v2477_v61  ;;  %v2559_v61 = vld [vmem:[#allocation5 + $0x3c8] ss:$16 sps:$4 sm:$0xff]  }
  0x98   :  { %1769 = vmatpush2.bf16.msra.mxu0 %v2472_v62  ;;  %v2564_v62 = vld [vmem:[#allocation5 + $0x1ac] ss:$16 sps:$4 sm:$0xff]  }
  0x99   :  { %1812 = vmatpush2.bf16.msra.mxu1 %v2475_v63  ;;  %1770 = vmatprep.subr.bf16.mxu0 %v2480_v0  ;;  %v2567_v63 = vld [vmem:[#allocation5 + $0x3ac] ss:$16 sps:$4 sm:$0xff]   ;;  %v2562_v0 = vld [vmem:[#allocation5 + $0x1a8] ss:$16 sps:$4 sm:$0xff]  }
  0x9a   :  { %1813 = vmatprep.subr.bf16.mxu1 %v2483_v1  ;;  %v2565_v1 = vld [vmem:[#allocation5 + $0x3a8] ss:$16 sps:$4 sm:$0xff]  }
  0x9c   :  { %1771 = vmatpush2.bf16.msra.mxu0 %v2478_v2  ;;  %v2570_v2 = vld [vmem:[#allocation5 + $0x18c] ss:$16 sps:$4 sm:$0xff]  }
  0x9d   :  { %1814 = vmatpush2.bf16.msra.mxu1 %v2481_v3  ;;  %1772 = vmatprep.subr.bf16.mxu0 %v2486_v4  ;;  %v2573_v3 = vld [vmem:[#allocation5 + $0x38c] ss:$16 sps:$4 sm:$0xff]   ;;  %v2568_v4 = vld [vmem:[#allocation5 + $0x188] ss:$16 sps:$4 sm:$0xff]  }
  0x9e   :  { %1815 = vmatprep.subr.bf16.mxu1 %v2489_v5  ;;  %v2571_v5 = vld [vmem:[#allocation5 + $0x388] ss:$16 sps:$4 sm:$0xff]  }
  0xa0   :  { %1773 = vmatpush2.bf16.msra.mxu0 %v2484_v6  ;;  %v2576_v6 = vld [vmem:[#allocation5 + $0x16c] ss:$16 sps:$4 sm:$0xff]  }
  0xa1   :  { %1816 = vmatpush2.bf16.msra.mxu1 %v2487_v7  ;;  %1774 = vmatprep.subr.bf16.mxu0 %v2492_v10  ;;  %v2579_v7 = vld [vmem:[#allocation5 + $0x36c] ss:$16 sps:$4 sm:$0xff]   ;;  %v2574_v10 = vld [vmem:[#allocation5 + $0x168] ss:$16 sps:$4 sm:$0xff]  }
  0xa2   :  { %1817 = vmatprep.subr.bf16.mxu1 %v2495_v11  ;;  %v2577_v11 = vld [vmem:[#allocation5 + $0x368] ss:$16 sps:$4 sm:$0xff]  }
  0xa4   :  { %1775 = vmatpush2.bf16.msra.mxu0 %v2490_v12  ;;  %v2582_v12 = vld [vmem:[#allocation5 + $0x14c] ss:$16 sps:$4 sm:$0xff]  }
  0xa5   :  { %1818 = vmatpush2.bf16.msra.mxu1 %v2493_v13  ;;  %1776 = vmatprep.subr.bf16.mxu0 %v2498_v14  ;;  %v2585_v13 = vld [vmem:[#allocation5 + $0x34c] ss:$16 sps:$4 sm:$0xff]   ;;  %v2580_v14 = vld [vmem:[#allocation5 + $0x148] ss:$16 sps:$4 sm:$0xff]  }
  0xa6   :  { %1819 = vmatprep.subr.bf16.mxu1 %v2501_v15  ;;  %v2583_v15 = vld [vmem:[#allocation5 + $0x348] ss:$16 sps:$4 sm:$0xff]  }
  0xa8   :  { %1777 = vmatpush2.bf16.msra.mxu0 %v2496_v16  ;;  %v2588_v16 = vld [vmem:[#allocation5 + $0x12c] ss:$16 sps:$4 sm:$0xff]  }
  0xa9   :  { %1820 = vmatpush2.bf16.msra.mxu1 %v2499_v17  ;;  %1832 = vmatprep.subr.bf16.mxu0 %v2504_v18  ;;  %v2591_v17 = vld [vmem:[#allocation5 + $0x32c] ss:$16 sps:$4 sm:$0xff]   ;;  %v2586_v18 = vld [vmem:[#allocation5 + $0x128] ss:$16 sps:$4 sm:$0xff]  }
  0xaa   :  { %1875 = vmatprep.subr.bf16.mxu1 %v2507_v19  ;;  %v2589_v19 = vld [vmem:[#allocation5 + $0x328] ss:$16 sps:$4 sm:$0xff]  }
  0xab   :  { %1779 = vmatmul.mubr.bf16.vlgmr.msra.gmra.mxu0 %v2852_v20 }
  0xac   :  { %1822 = vmatmul.mubr.bf16.vlgmr.msra.gmra.mxu1 %v2856_v21  ;;  %1833 = vmatpush1.bf16.msra.mxu0 %v2502_v22  ;;  %v2594_v22 = vld [vmem:[#allocation5 + $0x10c] ss:$16 sps:$4 sm:$0xff]  }
  0xad   :  { %1876 = vmatpush1.bf16.msra.mxu1 %v2505_v23  ;;  %1834 = vmatprep.subr.bf16.mxu0 %v2510_v24  ;;  %v2597_v23 = vld [vmem:[#allocation5 + $0x30c] ss:$16 sps:$4 sm:$0xff]   ;;  %v2592_v24 = vld [vmem:[#allocation5 + $0x108] ss:$16 sps:$4 sm:$0xff]  }
  0xae   :  { %1877 = vmatprep.subr.bf16.mxu1 %v2513_v25  ;;  %1864 = vmatprep.mubr.bf16.mxu0 %v2820_v53  ;;  %v2529_v53 = vld [vmem:[#allocation5 + $0x268] ss:$16 sps:$4 sm:$0xff]  }
  0xaf   :  { %1907 = vmatprep.mubr.bf16.mxu1 %v2822_v55  ;;  %v2534_v55 = vld [vmem:[#allocation5 + $0x4c] ss:$16 sps:$4 sm:$0xff]   ;;  %v2595_v25 = vld [vmem:[#allocation5 + $0x308] ss:$16 sps:$4 sm:$0xff]  }
  0xb0   :  { %1835 = vmatpush1.bf16.msra.mxu0 %v2508_v26  ;;  %v2600_v26 = vld [vmem:[#allocation5 + $0x4ec] ss:$16 sps:$4 sm:$0xff]  }
  0xb1   :  { %1878 = vmatpush1.bf16.msra.mxu1 %v2511_v27  ;;  %1836 = vmatprep.subr.bf16.mxu0 %v2516_v28  ;;  %v2603_v27 = vld [vmem:[#allocation5 + $0x6ec] ss:$16 sps:$4 sm:$0xff]   ;;  %v2598_v28 = vld [vmem:[#allocation5 + $0x4e8] ss:$16 sps:$4 sm:$0xff]  }
  0xb2   :  { %1879 = vmatprep.subr.bf16.mxu1 %v2519_v29  ;;  %v2601_v29 = vld [vmem:[#allocation5 + $0x6e8] ss:$16 sps:$4 sm:$0xff]  }
  0xb4   :  { %1837 = vmatpush1.bf16.msra.mxu0 %v2514_v30  ;;  %v2606_v30 = vld [vmem:[#allocation5 + $0x4cc] ss:$16 sps:$4 sm:$0xff]  }
  0xb5   :  { %1880 = vmatpush1.bf16.msra.mxu1 %v2517_v31  ;;  %1838 = vmatprep.subr.bf16.mxu0 %v2522_v32  ;;  %v2609_v31 = vld [vmem:[#allocation5 + $0x6cc] ss:$16 sps:$4 sm:$0xff]   ;;  %v2604_v32 = vld [vmem:[#allocation5 + $0x4c8] ss:$16 sps:$4 sm:$0xff]  }
  0xb6   :  { %1881 = vmatprep.subr.bf16.mxu1 %v2525_v33  ;;  %v2607_v33 = vld [vmem:[#allocation5 + $0x6c8] ss:$16 sps:$4 sm:$0xff]  }
  0xb8   :  { %1839 = vmatpush1.bf16.msra.mxu0 %v2520_v34  ;;  %v2612_v34 = vld [vmem:[#allocation5 + $0x4ac] ss:$16 sps:$4 sm:$0xff]  }
  0xb9   :  { %1882 = vmatpush1.bf16.msra.mxu1 %v2523_v35  ;;  %1840 = vmatprep.subr.bf16.mxu0 %v2528_v36  ;;  %v2615_v35 = vld [vmem:[#allocation5 + $0x6ac] ss:$16 sps:$4 sm:$0xff]   ;;  %v2610_v36 = vld [vmem:[#allocation5 + $0x4a8] ss:$16 sps:$4 sm:$0xff]  }
  0xba   :  { %1883 = vmatprep.subr.bf16.mxu1 %v2531_v37  ;;  %v2613_v37 = vld [vmem:[#allocation5 + $0x6a8] ss:$16 sps:$4 sm:$0xff]  }
  0xbc   :  { %1841 = vmatpush1.bf16.msra.mxu0 %v2526_v38  ;;  %v2616_v38 = vld [vmem:[#allocation5 + $0x488] ss:$16 sps:$4 sm:$0xff]  }
  0xbd   :  { %1884 = vmatpush1.bf16.msra.mxu1 %v2529_v53  ;;  %1842 = vmatprep.subr.bf16.mxu0 %v2534_v55  ;;  %v2619_v53 = vld [vmem:[#allocation5 + $0x688] ss:$16 sps:$4 sm:$0xff]   ;;  %v2624_v55 = vld [vmem:[#allocation5 + $0x46c] ss:$16 sps:$4 sm:$0xff]  }
  0xbe   :  { %1885 = vmatprep.subr.bf16.mxu1 %v2537_v39  ;;  %v2627_v39 = vld [vmem:[#allocation5 + $0x66c] ss:$16 sps:$4 sm:$0xff]  }
  0xc0   :  { %1843 = vmatpush1.bf16.msra.mxu0 %v2532_v40  ;;  %v2630_v40 = vld [vmem:[#allocation5 + $0x44c] ss:$16 sps:$4 sm:$0xff]  }
  0xc1   :  { %1886 = vmatpush1.bf16.msra.mxu1 %v2535_v42  ;;  %1844 = vmatprep.subr.bf16.mxu0 %v2540_v44  ;;  %v2633_v42 = vld [vmem:[#allocation5 + $0x64c] ss:$16 sps:$4 sm:$0xff]   ;;  %v2628_v44 = vld [vmem:[#allocation5 + $0x448] ss:$16 sps:$4 sm:$0xff]  }
  0xc2   :  { %1887 = vmatprep.subr.bf16.mxu1 %v2543_v45  ;;  %v2631_v45 = vld [vmem:[#allocation5 + $0x648] ss:$16 sps:$4 sm:$0xff]  }
  0xc4   :  { %1845 = vmatpush1.bf16.msra.mxu0 %v2538_v46  ;;  %v2636_v46 = vld [vmem:[#allocation5 + $0x42c] ss:$16 sps:$4 sm:$0xff]  }
  0xc5   :  { %1888 = vmatpush1.bf16.msra.mxu1 %v2541_v47  ;;  %1846 = vmatprep.subr.bf16.mxu0 %v2546_v48  ;;  %v2639_v47 = vld [vmem:[#allocation5 + $0x62c] ss:$16 sps:$4 sm:$0xff]   ;;  %v2634_v48 = vld [vmem:[#allocation5 + $0x428] ss:$16 sps:$4 sm:$0xff]  }
  0xc6   :  { %1889 = vmatprep.subr.bf16.mxu1 %v2549_v49  ;;  %v2637_v49 = vld [vmem:[#allocation5 + $0x628] ss:$16 sps:$4 sm:$0xff]  }
  0xc8   :  { %1847 = vmatpush1.bf16.msra.mxu0 %v2544_v50  ;;  %v2642_v50 = vld [vmem:[#allocation5 + $0x40c] ss:$16 sps:$4 sm:$0xff]  }
  0xc9   :  { %1890 = vmatpush1.bf16.msra.mxu1 %v2547_v51  ;;  %1848 = vmatprep.subr.bf16.mxu0 %v2552_v52  ;;  %v2645_v51 = vld [vmem:[#allocation5 + $0x60c] ss:$16 sps:$4 sm:$0xff]   ;;  %v2640_v52 = vld [vmem:[#allocation5 + $0x408] ss:$16 sps:$4 sm:$0xff]  }
  0xca   :  { %1891 = vmatprep.subr.bf16.mxu1 %v2555_v54  ;;  %v2643_v54 = vld [vmem:[#allocation5 + $0x608] ss:$16 sps:$4 sm:$0xff]  }
  0xcc   :  { %1849 = vmatpush2.bf16.msra.mxu0 %v2550_v56  ;;  %v2648_v56 = vld [vmem:[#allocation5 + $0x5ec] ss:$16 sps:$4 sm:$0xff]  }
  0xcd   :  { %1892 = vmatpush2.bf16.msra.mxu1 %v2553_v57  ;;  %1850 = vmatprep.subr.bf16.mxu0 %v2558_v58  ;;  %v2651_v57 = vld [vmem:[#allocation5 + $0x7ec] ss:$16 sps:$4 sm:$0xff]   ;;  %v2646_v58 = vld [vmem:[#allocation5 + $0x5e8] ss:$16 sps:$4 sm:$0xff]  }
  0xce   :  { %1893 = vmatprep.subr.bf16.mxu1 %v2561_v59  ;;  %v2649_v59 = vld [vmem:[#allocation5 + $0x7e8] ss:$16 sps:$4 sm:$0xff]  }
  0xd0   :  { %1851 = vmatpush2.bf16.msra.mxu0 %v2556_v60  ;;  %v2654_v60 = vld [vmem:[#allocation5 + $0x5cc] ss:$16 sps:$4 sm:$0xff]  }
  0xd1   :  { %1894 = vmatpush2.bf16.msra.mxu1 %v2559_v61  ;;  %1852 = vmatprep.subr.bf16.mxu0 %v2564_v62  ;;  %v2657_v61 = vld [vmem:[#allocation5 + $0x7cc] ss:$16 sps:$4 sm:$0xff]   ;;  %v2652_v62 = vld [vmem:[#allocation5 + $0x5c8] ss:$16 sps:$4 sm:$0xff]  }
  0xd2   :  { %1895 = vmatprep.subr.bf16.mxu1 %v2567_v63  ;;  %v2655_v63 = vld [vmem:[#allocation5 + $0x7c8] ss:$16 sps:$4 sm:$0xff]  }
  0xd4   :  { %1853 = vmatpush2.bf16.msra.mxu0 %v2562_v0  ;;  %v2660_v0 = vld [vmem:[#allocation5 + $0x5ac] ss:$16 sps:$4 sm:$0xff]  }
  0xd5   :  { %1896 = vmatpush2.bf16.msra.mxu1 %v2565_v1  ;;  %1854 = vmatprep.subr.bf16.mxu0 %v2570_v2  ;;  %v2663_v1 = vld [vmem:[#allocation5 + $0x7ac] ss:$16 sps:$4 sm:$0xff]   ;;  %v2658_v2 = vld [vmem:[#allocation5 + $0x5a8] ss:$16 sps:$4 sm:$0xff]  }
  0xd6   :  { %1897 = vmatprep.subr.bf16.mxu1 %v2573_v3  ;;  %v2661_v3 = vld [vmem:[#allocation5 + $0x7a8] ss:$16 sps:$4 sm:$0xff]  }
  0xd8   :  { %1855 = vmatpush2.bf16.msra.mxu0 %v2568_v4  ;;  %v2666_v4 = vld [vmem:[#allocation5 + $0x58c] ss:$16 sps:$4 sm:$0xff]  }
  0xd9   :  { %1898 = vmatpush2.bf16.msra.mxu1 %v2571_v5  ;;  %1856 = vmatprep.subr.bf16.mxu0 %v2576_v6  ;;  %v2669_v5 = vld [vmem:[#allocation5 + $0x78c] ss:$16 sps:$4 sm:$0xff]   ;;  %v2664_v6 = vld [vmem:[#allocation5 + $0x588] ss:$16 sps:$4 sm:$0xff]  }
  0xda   :  { %1899 = vmatprep.subr.bf16.mxu1 %v2579_v7  ;;  %v2667_v7 = vld [vmem:[#allocation5 + $0x788] ss:$16 sps:$4 sm:$0xff]  }
  0xdc   :  { %1857 = vmatpush2.bf16.msra.mxu0 %v2574_v10  ;;  %v2672_v10 = vld [vmem:[#allocation5 + $0x56c] ss:$16 sps:$4 sm:$0xff]  }
  0xdd   :  { %1900 = vmatpush2.bf16.msra.mxu1 %v2577_v11  ;;  %1858 = vmatprep.subr.bf16.mxu0 %v2582_v12  ;;  %v2675_v11 = vld [vmem:[#allocation5 + $0x76c] ss:$16 sps:$4 sm:$0xff]   ;;  %v2670_v12 = vld [vmem:[#allocation5 + $0x568] ss:$16 sps:$4 sm:$0xff]  }
  0xde   :  { %1901 = vmatprep.subr.bf16.mxu1 %v2585_v13  ;;  %v2673_v13 = vld [vmem:[#allocation5 + $0x768] ss:$16 sps:$4 sm:$0xff]  }
  0xe0   :  { %1859 = vmatpush2.bf16.msra.mxu0 %v2580_v14  ;;  %v2678_v14 = vld [vmem:[#allocation5 + $0x54c] ss:$16 sps:$4 sm:$0xff]  }
  0xe1   :  { %1902 = vmatpush2.bf16.msra.mxu1 %v2583_v15  ;;  %1860 = vmatprep.subr.bf16.mxu0 %v2588_v16  ;;  %v2681_v15 = vld [vmem:[#allocation5 + $0x74c] ss:$16 sps:$4 sm:$0xff]   ;;  %v2676_v16 = vld [vmem:[#allocation5 + $0x548] ss:$16 sps:$4 sm:$0xff]  }
  0xe2   :  { %1903 = vmatprep.subr.bf16.mxu1 %v2591_v17  ;;  %v2679_v17 = vld [vmem:[#allocation5 + $0x748] ss:$16 sps:$4 sm:$0xff]  }
  0xe4   :  { %1861 = vmatpush2.bf16.msra.mxu0 %v2586_v18  ;;  %v2684_v18 = vld [vmem:[#allocation5 + $0x52c] ss:$16 sps:$4 sm:$0xff]  }
  0xe5   :  { %1904 = vmatpush2.bf16.msra.mxu1 %v2589_v19  ;;  %1862 = vmatprep.subr.bf16.mxu0 %v2594_v22  ;;  %v2687_v19 = vld [vmem:[#allocation5 + $0x72c] ss:$16 sps:$4 sm:$0xff]   ;;  %v2682_v22 = vld [vmem:[#allocation5 + $0x528] ss:$16 sps:$4 sm:$0xff]  }
  0xe6   :  { %1905 = vmatprep.subr.bf16.mxu1 %v2597_v23  ;;  %v2685_v23 = vld [vmem:[#allocation5 + $0x728] ss:$16 sps:$4 sm:$0xff]  }
  0xe8   :  { %1863 = vmatpush2.bf16.msra.mxu0 %v2592_v24  ;;  %v2690_v24 = vld [vmem:[#allocation5 + $0x50c] ss:$16 sps:$4 sm:$0xff]  }
  0xe9   :  { %1906 = vmatpush2.bf16.msra.mxu1 %v2595_v25  ;;  %1918 = vmatprep.subr.bf16.mxu0 %v2600_v26  ;;  %v2693_v25 = vld [vmem:[#allocation5 + $0x70c] ss:$16 sps:$4 sm:$0xff]   ;;  %v2688_v26 = vld [vmem:[#allocation5 + $0x508] ss:$16 sps:$4 sm:$0xff]  }
  0xea   :  { %1961 = vmatprep.subr.bf16.mxu1 %v2603_v27  ;;  %v2691_v27 = vld [vmem:[#allocation5 + $0x708] ss:$16 sps:$4 sm:$0xff]  }
  0xeb   :  { %1865 = vmatmul.mubr.bf16.vlgmr.msra.gmra.mxu0 %v2826_v8  ;;  %v2618_v8 = vld [vmem:[#allocation5 + $0x48c] ss:$16 sps:$4 sm:$0xff]  }
  0xec   :  { %1908 = vmatmul.mubr.bf16.vlgmr.msra.gmra.mxu1 %v2828_v9  ;;  %1919 = vmatpush1.bf16.msra.mxu0 %v2598_v28  ;;  %v2621_v9 = vld [vmem:[#allocation5 + $0x68c] ss:$16 sps:$4 sm:$0xff]   ;;  %v320_v28 = vlaneseq }
  0xed   :  { %1962 = vmatpush1.bf16.msra.mxu1 %v2601_v29  ;;  %1920 = vmatprep.subr.bf16.mxu0 %v2606_v30 }
  0xee   :  { %1963 = vmatprep.subr.bf16.mxu1 %v2609_v31  ;;  %1950 = vmatprep.mubr.bf16.mxu0 %v2842_v41  ;;  %v2622_v41 = vld [vmem:[#allocation5 + $0x468] ss:$16 sps:$4 sm:$0xff]   ;;  %v321_v29 = vshrl.u32 %v320_v28, 7 }
  0xef   :  { %1993 = vmatprep.mubr.bf16.mxu1 %v2846_v43  ;;  %v2625_v43 = vld [vmem:[#allocation5 + $0x668] ss:$16 sps:$4 sm:$0xff]  }
  0xf0   :  { %1921 = vmatpush1.bf16.msra.mxu0 %v2604_v32  ;;  %v322_v32 = vsub.s32 0, %v321_v29 }
  0xf1   :  { %1964 = vmatpush1.bf16.msra.mxu1 %v2607_v33  ;;  %1922 = vmatprep.subr.bf16.mxu0 %v2612_v34  ;;  %v318_v33 = vld [vmem:[#allocation7] sm:$0xf]  ;;  %v326_v34 = vsub.s32 1, %v321_v29 }
  0xf2   :  { %1965 = vmatprep.subr.bf16.mxu1 %v2615_v35 }
  0xf4   :  { %1923 = vmatpush1.bf16.msra.mxu0 %v2610_v36 }
  0xf5   :  { %1966 = vmatpush1.bf16.msra.mxu1 %v2613_v37  ;;  %1924 = vmatprep.subr.bf16.mxu0 %v2618_v8  ;;  %v323_v37 = vrot.slane %v318_v33, %v322_v32  ;;  %v327_v8 = vrot.slane %v318_v33, %v326_v34 }
  0xf6   :  { %1967 = vmatprep.subr.bf16.mxu1 %v2621_v9 }
  0xf8   :  { %1925 = vmatpush1.bf16.msra.mxu0 %v2616_v38 }
  0xf9   :  { %1968 = vmatpush1.bf16.msra.mxu1 %v2619_v53  ;;  %1926 = vmatprep.subr.bf16.mxu0 %v2624_v55 }
  0xfa   :  { %1969 = vmatprep.subr.bf16.mxu1 %v2627_v39 }
  0xfc   :  { %1927 = vmatpush1.bf16.msra.mxu0 %v2622_v41 }
  0xfd   :  { %1970 = vmatpush1.bf16.msra.mxu1 %v2625_v43  ;;  %1928 = vmatprep.subr.bf16.mxu0 %v2630_v40 }
  0xfe   :  { %1971 = vmatprep.subr.bf16.mxu1 %v2633_v42 }
 0x100   :  { %1929 = vmatpush1.bf16.msra.mxu0 %v2628_v44 }
 0x101   :  { %1972 = vmatpush1.bf16.msra.mxu1 %v2631_v45  ;;  %1930 = vmatprep.subr.bf16.mxu0 %v2636_v46 }
 0x102   :  { %1973 = vmatprep.subr.bf16.mxu1 %v2639_v47 }
 0x104   :  { %1931 = vmatpush1.bf16.msra.mxu0 %v2634_v48 }
 0x105   :  { %1974 = vmatpush1.bf16.msra.mxu1 %v2637_v49  ;;  %1932 = vmatprep.subr.bf16.mxu0 %v2642_v50 }
 0x106   :  { %1975 = vmatprep.subr.bf16.mxu1 %v2645_v51 }
 0x108   :  { %1933 = vmatpush1.bf16.msra.mxu0 %v2640_v52 }
 0x109   :  { %1976 = vmatpush1.bf16.msra.mxu1 %v2643_v54  ;;  %1934 = vmatprep.subr.bf16.mxu0 %v2648_v56 }
 0x10a   :  { %1977 = vmatprep.subr.bf16.mxu1 %v2651_v57 }
 0x10c   :  { %1935 = vmatpush2.bf16.msra.mxu0 %v2646_v58 }
 0x10d   :  { %1978 = vmatpush2.bf16.msra.mxu1 %v2649_v59  ;;  %1936 = vmatprep.subr.bf16.mxu0 %v2654_v60 }
 0x10e   :  { %1979 = vmatprep.subr.bf16.mxu1 %v2657_v61 }
 0x110   :  { %1937 = vmatpush2.bf16.msra.mxu0 %v2652_v62 }
 0x111   :  { %1980 = vmatpush2.bf16.msra.mxu1 %v2655_v63  ;;  %1938 = vmatprep.subr.bf16.mxu0 %v2660_v0 }
 0x112   :  { %1981 = vmatprep.subr.bf16.mxu1 %v2663_v1 }
 0x114   :  { %1939 = vmatpush2.bf16.msra.mxu0 %v2658_v2 }
 0x115   :  { %1982 = vmatpush2.bf16.msra.mxu1 %v2661_v3  ;;  %1940 = vmatprep.subr.bf16.mxu0 %v2666_v4 }
 0x116   :  { %1983 = vmatprep.subr.bf16.mxu1 %v2669_v5  ;;  %v330_v5 = vsub.s32 2, %v321_v29 }
 0x118   :  { %1941 = vmatpush2.bf16.msra.mxu0 %v2664_v6  ;;  %v334_v6 = vsub.s32 3, %v321_v29 }
 0x119   :  { %1984 = vmatpush2.bf16.msra.mxu1 %v2667_v7  ;;  %1942 = vmatprep.subr.bf16.mxu0 %v2672_v10 }
 0x11a   :  { %1985 = vmatprep.subr.bf16.mxu1 %v2675_v11  ;;  %v331_v11 = vrot.slane %v318_v33, %v330_v5 }
 0x11c   :  { %1943 = vmatpush2.bf16.msra.mxu0 %v2670_v12  ;;  %v335_v12 = vrot.slane %v318_v33, %v334_v6 }
 0x11d   :  { %1986 = vmatpush2.bf16.msra.mxu1 %v2673_v13  ;;  %1944 = vmatprep.subr.bf16.mxu0 %v2678_v14 }
 0x11e   :  { %1987 = vmatprep.subr.bf16.mxu1 %v2681_v15 }
 0x120   :  { %1945 = vmatpush2.bf16.msra.mxu0 %v2676_v16 }
 0x121   :  { %1988 = vmatpush2.bf16.msra.mxu1 %v2679_v17  ;;  %1946 = vmatprep.subr.bf16.mxu0 %v2684_v18 }
 0x122   :  { %1989 = vmatprep.subr.bf16.mxu1 %v2687_v19 }
 0x124   :  { %1947 = vmatpush2.bf16.msra.mxu0 %v2682_v22 }
 0x125   :  { %1990 = vmatpush2.bf16.msra.mxu1 %v2685_v23  ;;  %1948 = vmatprep.subr.bf16.mxu0 %v2690_v24 }
 0x126   :  { %1991 = vmatprep.subr.bf16.mxu1 %v2693_v25 }
 0x128   :  { %1949 = vmatpush2.bf16.msra.mxu0 %v2688_v26 }
 0x129   :  { %1992 = vmatpush2.bf16.msra.mxu1 %v2691_v27 }
 0x12b   :  { %1951 = vmatmul.mubr.bf16.vlgmr.msra.gmra.mxu0 %v2852_v20  ;;  %v1694_v30 = vpop.f32.mrf.mxu0 }
 0x12c   :  { %1994 = vmatmul.mubr.bf16.vlgmr.msra.gmra.mxu1 %v2856_v21  ;;  %v1737_v31 = vpop.f32.mrf.mxu1  ;;  %v1695_v53 = vadd.f32 %v1694_v30, %v323_v37 }
 0x12d   :  { %v1696_v35 = vpop.f32.mrf.mxu0 }
 0x12e   :  { %v1739_v36 = vpop.f32.mrf.mxu1  ;;  %v1697_v55 = vadd.f32 %v1696_v35, %v327_v8  ;;  %v1738_v20 = vadd.f32 %v1737_v31, %v1695_v53 }
 0x12f   :  { %v1698_v9 = vpop.f32.mrf.mxu0 }
 0x130   :  { %v1741_v38 = vpop.f32.mrf.mxu1  ;;  %v1699_v43 = vadd.f32 %v1698_v9, %v323_v37  ;;  %v1740_v42 = vadd.f32 %v1739_v36, %v1697_v55 }
 0x131   :  { %v1700_v39 = vpop.f32.mrf.mxu0 }
 0x132   :  { %v1743_v41 = vpop.f32.mrf.mxu1  ;;  %v1701_v44 = vadd.f32 %v1700_v39, %v327_v8  ;;  %v1742_v48 = vadd.f32 %v1741_v38, %v1699_v43 }
 0x134   :  { %v1744_v54 = vadd.f32 %v1743_v41, %v1701_v44 }
 0x16b   :  { %v1780_v21 = vpop.f32.mrf.mxu0 }
 0x16c   :  { %v1823_v40 = vpop.f32.mrf.mxu1  ;;  %v1781_v45 = vadd.f32 %v1780_v21, %v1738_v20 }
 0x16d   :  { %v1782_v46 = vpop.f32.mrf.mxu0 }
 0x16e   :  { %v1825_v47 = vpop.f32.mrf.mxu1  ;;  %v1824_v49 = vadd.f32 %v1823_v40, %v1781_v45  ;;  %v1783_v50 = vadd.f32 %v1782_v46, %v1740_v42 }
 0x16f   :  { %v1784_v51 = vpop.f32.mrf.mxu0 }
 0x170   :  { %v1827_v52 = vpop.f32.mrf.mxu1  ;;  %v2004_v56 = vmax.f32 %v1824_v49, 0.0  ;;  %v1826_v57 = vadd.f32 %v1825_v47, %v1783_v50  ;;  %v1785_v58 = vadd.f32 %v1784_v51, %v1742_v48 }
 0x171   :  { %v1786_v59 = vpop.f32.mrf.mxu0 }
 0x172   :  { %2012 = vst [vmem:[#allocation8] sm:$0xff] %v2004_v56  ;;  %v2005_v60 = vmax.f32 %v1826_v57, 0.0  ;;  %v1828_v61 = vadd.f32 %v1827_v52, %v1785_v58  ;;  %v1787_v62 = vadd.f32 %v1786_v59, %v1744_v54  ;;  %v1829_v63 = vpop.f32.mrf.mxu1 }
 0x174   :  { %2013 = vst [vmem:[#allocation8 + $0x8] sm:$0xff] %v2005_v60  ;;  %v2008_v0 = vmax.f32 %v1828_v61, 0.0  ;;  %v1830_v1 = vadd.f32 %v1829_v63, %v1787_v62 }
 0x176   :  { %2016 = vst [vmem:[#allocation8 + $0x20] sm:$0xff] %v2008_v0  ;;  %v2009_v2 = vmax.f32 %v1830_v1, 0.0 }
 0x178   :  { %2017 = vst [vmem:[#allocation8 + $0x28] sm:$0xff] %v2009_v2 }
 0x1ab   :  { %v1866_v3 = vpop.f32.mrf.mxu0 }
 0x1ac   :  { %v1909_v4 = vpop.f32.mrf.mxu1  ;;  %v1867_v15 = vadd.f32 %v1866_v3, %v331_v11 }
 0x1ad   :  { %v1868_v7 = vpop.f32.mrf.mxu0 }
 0x1ae   :  { %v1911_v10 = vpop.f32.mrf.mxu1  ;;  %v1869_v16 = vadd.f32 %v1868_v7, %v335_v12  ;;  %v1910_v19 = vadd.f32 %v1909_v4, %v1867_v15 }
 0x1af   :  { %v1870_v13 = vpop.f32.mrf.mxu0 }
 0x1b0   :  { %v1913_v14 = vpop.f32.mrf.mxu1  ;;  %v1871_v22 = vadd.f32 %v1870_v13, %v331_v11  ;;  %v1912_v25 = vadd.f32 %v1911_v10, %v1869_v16 }
 0x1b1   :  { %v1872_v17 = vpop.f32.mrf.mxu0 }
 0x1b2   :  { %v1915_v18 = vpop.f32.mrf.mxu1  ;;  %v1873_v26 = vadd.f32 %v1872_v17, %v335_v12  ;;  %v1914_v29 = vadd.f32 %v1913_v14, %v1871_v22 }
 0x1b4   :  { %v1916_v35 = vadd.f32 %v1915_v18, %v1873_v26 }
 0x1eb   :  { %v1952_v23 = vpop.f32.mrf.mxu0 }
 0x1ec   :  { %v1995_v24 = vpop.f32.mrf.mxu1  ;;  %v1953_v27 = vadd.f32 %v1952_v23, %v1910_v19 }
 0x1ed   :  { %v1954_v28 = vpop.f32.mrf.mxu0 }
 0x1ee   :  { %v1997_v30 = vpop.f32.mrf.mxu1  ;;  %v1996_v31 = vadd.f32 %v1995_v24, %v1953_v27  ;;  %v1955_v32 = vadd.f32 %v1954_v28, %v1912_v25 }
 0x1ef   :  { %v1956_v34 = vpop.f32.mrf.mxu0 }
 0x1f0   :  { %v1999_v33 = vpop.f32.mrf.mxu1  ;;  %v2006_v36 = vmax.f32 %v1996_v31, 0.0  ;;  %v1998_v37 = vadd.f32 %v1997_v30, %v1955_v32  ;;  %v1957_v8 = vadd.f32 %v1956_v34, %v1914_v29 }
 0x1f1   :  { %v1958_v9 = vpop.f32.mrf.mxu0 }
 0x1f2   :  { %2014 = vst [vmem:[#allocation8 + $0x10] sm:$0xff] %v2006_v36  ;;  %v2007_v38 = vmax.f32 %v1998_v37, 0.0  ;;  %v2000_v53 = vadd.f32 %v1999_v33, %v1957_v8  ;;  %v1959_v55 = vadd.f32 %v1958_v9, %v1916_v35  ;;  %v2001_v39 = vpop.f32.mrf.mxu1 }
 0x1f4   :  { %2015 = vst [vmem:[#allocation8 + $0x18] sm:$0xff] %v2007_v38  ;;  %v2010_v41 = vmax.f32 %v2000_v53, 0.0  ;;  %v2002_v20 = vadd.f32 %v2001_v39, %v1959_v55 }
 0x1f6   :  { %2018 = vst [vmem:[#allocation8 + $0x30] sm:$0xff] %v2010_v41  ;;  %v2011_v43 = vmax.f32 %v2002_v20, 0.0 }
 0x1f8   :  { %2019 = vst [vmem:[#allocation8 + $0x38] sm:$0xff] %v2011_v43 }
 0x1f9   :  { %2024 = vsyncadd [#allocation4], 512  ;;  %s2787_s0 = smov [#allocation8]  }
 0x1fa   :  { %s2025_s2 = sshll.u32 %s2787_s0, 4  ;;  %s2026_s2 = int_to_ptr.vmem [resolvable:$true] %s2025_s2 }
 0x1fb   :  { %s2754_s4 = scalar_lea.vmem %s2026_s2, 512  ;;  %s2758_s5 = scalar_lea.vmem %s2026_s2, 1024 }
 0x1fc   :  { %p2755_p1 = scmp.ne.s32.totalorder %s2026_s2, %s2754_s4  ;;  %p2759_p2 = scmp.lt.s32.totalorder %s2026_s2, %s2026_s2 }
 0x1fd   :  { %p2760_p3 = scmp.lt.s32.totalorder %s2758_s5, %s2754_s4 }
 0x1ff   :  { %p2761_p4 = por %p2760_p3, %p2759_p2 }
 0x201   :  { %p2762_p5 = pnand %p2761_p4, %p2755_p1 }
 0x203   :  { %2765 = shalt.err (!%p2762_p5)
}
 0x204   :  { %2031 = dma.vmem_to_hbm [thread:$0]  %s2026_s2, 512, %s2877_s3, [#allocation4], %s2784_s23, %s2784_s23, %s2785_s24  }
 0x205   :  { %2778 = dma.done.wait [#allocation4], 1024  }
 0x206   :  { %2779 = vsyncadd [#allocation4], 4294966272 }
 0x207   :  { %2035 = vsyncpa [#allocation3], 1 }
 0x208   :  { %2036 = vsyncpa [#allocation6], 1 }
 0x209   :  { %2037 = vsyncpa [#allocation4], 1 }

</bundles_post_ra>
